<compile_context>
chip_gen: v7x
topology: tpu7x:2x2x1
jax: 0.10.0
libtpu: 0.0.40
codegen_flags: <defaults>
</compile_context>

<pallas_src>
import functools

import jax
import jax.numpy as jnp
from jax import lax
from jax.experimental import pallas as pl
from jax.experimental.pallas import tpu as pltpu

LEAKY_SLOPE = 0.2
BN_EPS = 1e-5
# 48 MiB scoped VMEM: ample for tile_hw=8192 (~15 MB live), safe on v7x (64 MiB
# physical) and required on v5e (default scoped limit is only 16 MiB).
VMEM_LIMIT_BYTES = 48 * 1024 * 1024


def _leaky_relu(x):
    return jnp.where(x >= 0, x, LEAKY_SLOPE * x)


def _conv1_vpu(x, w1t, b1, cin):
    # x: (cin, T), w1t: (ndf, cin), b1: (ndf, 1) -> (ndf, T).
    # K = cin is tiny (2), so do broadcast FMAs on the VPU instead of an MXU pass.
    acc = b1
    for c in range(cin):  # cin is a static Python int
        acc = acc + w1t[:, c:c + 1] * x[c:c + 1, :]
    return acc


def _stats_kernel(x_ref, w1t_ref, b1_ref, s1_ref, gram_ref, *, cin, tile, hw):
    """Pass 1: per-batch accumulation of s1 = sum_m h1 and G = h1 @ h1^T over HW tiles."""
    j = pl.program_id(1)  # HW-tile index (reduction axis, last in grid)

    @pl.when(j == 0)
    def _():
        s1_ref[...] = jnp.zeros_like(s1_ref)
        gram_ref[...] = jnp.zeros_like(gram_ref)

    x = x_ref[...]                                                     # (cin, T)
    h1 = _leaky_relu(_conv1_vpu(x, w1t_ref[...], b1_ref[...], cin))    # (ndf, T)

    if hw % tile != 0:
        # Mask the ragged tail (conv2 has no bias, so h1 == 0 => zero h2 contribution).
        col = j * tile + lax.broadcasted_iota(jnp.int32, (1, tile), 1)
        h1 = jnp.where(col < hw, h1, 0.0)

    s1_ref[...] += jnp.sum(h1, axis=1, keepdims=True)                  # (ndf, 1)
    # Gram matrix in f32: K = tile => near-perfect MXU utilization; f32 operands
    # keep the derived variance numerically close to the reference.
    gram_ref[...] += lax.dot_general(
        h1, h1, dimension_numbers=(((1,), (1,)), ((), ())),
        preferred_element_type=jnp.float32)                            # (ndf, ndf)


def _apply_kernel(x_ref, w1t_ref, b1_ref, w2s_ref, shift_ref, w3t_ref, o_ref, *, cin):
    """Pass 2: conv1 -> (BN-scaled) conv2 in bf16 -> +shift -> LeakyReLU -> conv3 on MXU."""
    x = x_ref[...]                                                     # (cin, T)
    h1 = _leaky_relu(_conv1_vpu(x, w1t_ref[...], b1_ref[...], cin))    # (ndf, T) f32
    # conv2 with BN scale pre-folded into the weight; bf16 operands, f32 accumulation.
    h2 = jnp.dot(w2s_ref[...], h1.astype(jnp.bfloat16),
                 preferred_element_type=jnp.float32)                   # (2*ndf, T)
    h3 = _leaky_relu(h2 + shift_ref[...])                              # (2*ndf, T)
    # conv3 (2*ndf -> 1) as an MXU vector-matrix product (MXU has slack in pass 2),
    # writing directly to the lane-dense (1, T) output tile.
    o_ref[...] = jnp.dot(w3t_ref[...], h3, preferred_element_type=jnp.float32)


def init_params(key, input_nc=2, ndf=64):
    """Synthetic parameters with the PixelDiscriminator layer shapes (channel-major)."""
    k1, k2, k3, k4, k5, k6 = jax.random.split(key, 6)
    w1t = jax.random.normal(k1, (ndf, input_nc), jnp.float32) * 0.1       # conv1 weight (Cout, Cin)
    b1 = jax.random.normal(k2, (ndf, 1), jnp.float32) * 0.1               # conv1 bias
    w2t = jax.random.normal(k3, (2 * ndf, ndf), jnp.float32) * 0.1        # conv2 weight (no bias)
    gamma = 1.0 + jax.random.normal(k4, (2 * ndf, 1), jnp.float32) * 0.1  # BN weight
    beta = jax.random.normal(k5, (2 * ndf, 1), jnp.float32) * 0.1         # BN bias
    w3 = jax.random.normal(k6, (2 * ndf, 1), jnp.float32) * 0.1           # conv3 weight (no bias)
    return w1t, b1, w2t, gamma, beta, w3


def pixel_discriminator(x_nchw, params, tile_hw=8192):
    # tile_hw: lane-multiple of 128.  8192 amortizes the ~0.35 us/grid-step overhead
    # and is safe on v7x (64 MiB VMEM); v5e/v6e (128 MiB) can use up to 16384.
    w1t, b1, w2t, gamma, beta, w3 = params
    ndf, cin = w1t.shape
    c2 = w2t.shape[0]
    n, c, h, w = x_nchw.shape
    assert c == cin, (c, cin)
    assert tile_hw % 128 == 0
    hw = h * w
    m = n * hw

    # Free reshape (no data movement): (N, C, H, W) -> (N, C, H*W).
    x3 = x_nchw.reshape(n, c, hw)
    if x3.dtype != jnp.float32:
        x3 = x3.astype(jnp.float32)

    tile = min(tile_hw, ((hw + 127) // 128) * 128)   # lane-multiple of 128
    n_hw = pl.cdiv(hw, tile)
    grid = (n, n_hw)
    wmap = lambda b, j: (0, 0)                       # resident weights: no per-step DMA

    # ---- Pass 1: per-batch partial (s1, Gram) accumulators over HW tiles ----
    s1_part, gram_part = pl.pallas_call(
        functools.partial(_stats_kernel, cin=cin, tile=tile, hw=hw),
        out_shape=[jax.ShapeDtypeStruct((n, ndf, 1), jnp.float32),
                   jax.ShapeDtypeStruct((n, ndf, ndf), jnp.float32)],
        grid_spec=pltpu.PrefetchScalarGridSpec(
            num_scalar_prefetch=0,
            grid=grid,
            in_specs=[
                pl.BlockSpec((None, cin, tile), lambda b, j: (b, 0, j)),  # x tile (lane-dense)
                pl.BlockSpec((ndf, cin), wmap),                           # conv1 weight
                pl.BlockSpec((ndf, 1), wmap),                             # conv1 bias
            ],
            out_specs=[
                pl.BlockSpec((None, ndf, 1), lambda b, j: (b, 0, 0)),     # s1 partial (per batch)
                pl.BlockSpec((None, ndf, ndf), lambda b, j: (b, 0, 0)),   # Gram partial (per batch)
            ],
        ),
        compiler_params=pltpu.CompilerParams(
            dimension_semantics=("parallel", "arbitrary"),  # batch axis megacore-splittable
            vmem_limit_bytes=VMEM_LIMIT_BYTES),
    )(x3, w1t, b1)

    # Tiny per-channel arithmetic done in plain JAX.
    s1 = jnp.sum(s1_part, axis=0)                     # (ndf, 1)
    gram = jnp.sum(gram_part, axis=0)                 # (ndf, ndf)
    sum_h2 = w2t @ s1                                 # (2*ndf, 1)
    sumsq_h2 = jnp.sum((w2t @ gram) * w2t, axis=1, keepdims=True)   # (2*ndf, 1)
    mean = sum_h2 * (1.0 / m)
    var = sumsq_h2 * (1.0 / m) - mean * mean          # biased variance (train-mode BN)
    inv_std = lax.rsqrt(var + BN_EPS)
    scale = gamma * inv_std                           # (2*ndf, 1)
    shift = beta - mean * scale                       # (2*ndf, 1)
    # Fold BN scale into conv2 weight; bf16 operands for the MXU.
    w2s_bf16 = (w2t * scale).astype(jnp.bfloat16)     # (2*ndf, ndf)
    w3t = w3.T                                        # (1, 2*ndf), f32 (keeps conv3 accurate)
    # TODO(synk): running_mean/running_var buffer updates (momentum) are not modeled;
    # only the forward normalization with batch statistics is computed.

    # ---- Pass 2: conv1 -> scaled conv2 (bf16) -> +shift -> LeakyReLU -> conv3 ----
    out3 = pl.pallas_call(
        functools.partial(_apply_kernel, cin=cin),
        out_shape=jax.ShapeDtypeStruct((n, 1, hw), jnp.float32),
        grid_spec=pltpu.PrefetchScalarGridSpec(
            num_scalar_prefetch=0,
            grid=grid,
            in_specs=[
                pl.BlockSpec((None, cin, tile), lambda b, j: (b, 0, j)),  # x tile
                pl.BlockSpec((ndf, cin), wmap),                           # conv1 weight
                pl.BlockSpec((ndf, 1), wmap),                             # conv1 bias
                pl.BlockSpec((c2, ndf), wmap),                            # conv2 weight * BN scale (bf16)
                pl.BlockSpec((c2, 1), wmap),                              # BN shift
                pl.BlockSpec((1, c2), wmap),                              # conv3 weight (row vector)
            ],
            out_specs=pl.BlockSpec((None, 1, tile), lambda b, j: (b, 0, j)),  # lane-dense output
        ),
        compiler_params=pltpu.CompilerParams(
            dimension_semantics=("parallel", "parallel"),   # megacore on v7x
            vmem_limit_bytes=VMEM_LIMIT_BYTES),
    )(x3, w1t, b1, w2s_bf16, shift, w3t)

    # Free reshape: (N, 1, H*W) -> (N, 1, H, W).
    return out3.reshape(n, 1, h, w)


def pixel_discriminator_reference(x_nchw, params):
    """Pure-JAX reference matching PyTorch PixelDiscriminator in train mode (f32)."""
    w1t, b1, w2t, gamma, beta, w3 = params
    n, c, h, w = x_nchw.shape
    xf = jnp.transpose(x_nchw, (0, 2, 3, 1)).reshape(-1, c).astype(jnp.float32)
    h1 = _leaky_relu(xf @ w1t.T + b1[:, 0])
    h2 = h1 @ w2t.T
    mean = jnp.mean(h2, axis=0)
    var = jnp.mean((h2 - mean) ** 2, axis=0)          # biased
    h2n = (h2 - mean) * lax.rsqrt(var + BN_EPS) * gamma[:, 0] + beta[:, 0]
    h3 = _leaky_relu(h2n)
    o = h3 @ w3                                       # (M, 1)
    return jnp.transpose(o.reshape(n, h, w, 1), (0, 3, 1, 2))


if __name__ == "__main__":
    key = jax.random.PRNGKey(0)
    kx, kp = jax.random.split(key)

    N, INPUT_NC, H, W = 2, 2, 20, 20     # HW = 400 pixels per image, M = 800
    NDF = 64
    TILE_HW = 256                        # small tile for the toy test: 2 HW tiles/batch,
                                         # exercises the Gram accumulation, the ragged-tail
                                         # mask and partial output writes
                                         # (use the 8192 default for realistic image sizes)

    x = jax.random.normal(kx, (N, INPUT_NC, H, W), jnp.float32)
    params = init_params(kp, input_nc=INPUT_NC, ndf=NDF)

    out = pixel_discriminator(x, params, tile_hw=TILE_HW)
    out = jax.block_until_ready(out)
    assert out.shape == (N, 1, H, W), out.shape

    ref = jax.block_until_ready(pixel_discriminator_reference(x, params))
    # Tolerance sized for the bf16 conv2 path (output scale ~0.6, so ~3-4% relative);
    # the f32 Gram-based stats keep mean/var essentially exact.
    max_err = float(jnp.max(jnp.abs(out - ref)))
    assert max_err < 2.5e-2, f"max abs err {max_err}"
    print("KERNEL_OK")
</pallas_src>

<mosaic_0001>
module attributes {stable_mosaic.version = 11 : i64} {
  func.func @_stats_kernel(%arg0: i32, %arg1: i32, %arg2: memref<1x2x256xf32, #tpu.memory_space<vmem>>, %arg3: memref<64x2xf32, #tpu.memory_space<vmem>>, %arg4: memref<64x1xf32, #tpu.memory_space<vmem>>, %arg5: memref<1x64x1xf32, #tpu.memory_space<vmem>>, %arg6: memref<1x64x64xf32, #tpu.memory_space<vmem>>) attributes {dimension_semantics = [#tpu.dimension_semantics<parallel>, #tpu.dimension_semantics<arbitrary>], iteration_bounds = array<i64: 2, 2>, scalar_prefetch = 0 : i64, scratch_operands = 0 : i64, tpu.core_type = #tpu.core_type<tc>, window_params = [{transform_indices = @transform_0, window_bounds = array<i64: 1, 2, 256>}, {pipeline_mode = #tpu.pipeline_mode<synchronous>, transform_indices = @transform_1, window_bounds = array<i64: 64, 2>}, {pipeline_mode = #tpu.pipeline_mode<synchronous>, transform_indices = @transform_2, window_bounds = array<i64: 64, 1>}, {transform_indices = @transform_3, window_bounds = array<i64: 1, 64, 1>}, {transform_indices = @transform_4, window_bounds = array<i64: 1, 64, 64>}]} {
    %c0_i32 = arith.constant 0 : i32
    %0 = arith.cmpi eq, %arg1, %c0_i32 : i32
    %1 = arith.extui %0 : i1 to i32
    %c0_i32_0 = arith.constant 0 : i32
    %2 = arith.cmpi ne, %1, %c0_i32_0 : i32
    scf.if %2 {
      %cst_23 = arith.constant 0.000000e+00 : f32
      %50 = vector.broadcast %cst_23 : f32 to vector<64x1xf32>
      %c0_24 = arith.constant 0 : index
      %c0_25 = arith.constant 0 : index
      %c0_26 = arith.constant 0 : index
      %51 = vector.load %arg5[%c0_24, %c0_25, %c0_26] : memref<1x64x1xf32, #tpu.memory_space<vmem>>, vector<1x64x1xf32>
      %52 = vector.shape_cast %51 : vector<1x64x1xf32> to vector<64x1xf32>
      %53 = vector.shape_cast %50 : vector<64x1xf32> to vector<1x64x1xf32>
      tpu.vector_store %arg5[%c0_24, %c0_25, %c0_26], %53 {strides = array<i32>} : memref<1x64x1xf32, #tpu.memory_space<vmem>>, vector<1x64x1xf32>,
      %cst_27 = arith.constant 0.000000e+00 : f32
      %54 = vector.broadcast %cst_27 : f32 to vector<64x64xf32>
      %c0_28 = arith.constant 0 : index
      %c0_29 = arith.constant 0 : index
      %c0_30 = arith.constant 0 : index
      %55 = vector.load %arg6[%c0_28, %c0_29, %c0_30] : memref<1x64x64xf32, #tpu.memory_space<vmem>>, vector<1x64x64xf32>
      %56 = vector.shape_cast %55 : vector<1x64x64xf32> to vector<64x64xf32>
      %57 = vector.shape_cast %54 : vector<64x64xf32> to vector<1x64x64xf32>
      tpu.vector_store %arg6[%c0_28, %c0_29, %c0_30], %57 {strides = array<i32>} : memref<1x64x64xf32, #tpu.memory_space<vmem>>, vector<1x64x64xf32>,
    } else {
    }
    %c0 = arith.constant 0 : index
    %c0_1 = arith.constant 0 : index
    %c0_2 = arith.constant 0 : index
    %3 = vector.load %arg2[%c0, %c0_1, %c0_2] : memref<1x2x256xf32, #tpu.memory_space<vmem>>, vector<1x2x256xf32>
    %4 = vector.shape_cast %3 : vector<1x2x256xf32> to vector<2x256xf32>
    %c0_3 = arith.constant 0 : index
    %c0_4 = arith.constant 0 : index
    %5 = vector.load %arg3[%c0_3, %c0_4] : memref<64x2xf32, #tpu.memory_space<vmem>>, vector<64x2xf32>
    %c0_5 = arith.constant 0 : index
    %c0_6 = arith.constant 0 : index
    %6 = vector.load %arg4[%c0_5, %c0_6] : memref<64x1xf32, #tpu.memory_space<vmem>>, vector<64x1xf32>
    %7 = vector.extract_strided_slice %5 {offsets = [0, 0], sizes = [64, 1], strides = [1, 1]} : vector<64x2xf32> to vector<64x1xf32>
    %8 = vector.extract_strided_slice %4 {offsets = [0, 0], sizes = [1, 256], strides = [1, 1]} : vector<2x256xf32> to vector<1x256xf32>
    %9 = vector.broadcast %7 : vector<64x1xf32> to vector<64x256xf32>
    %10 = vector.broadcast %8 : vector<1x256xf32> to vector<64x256xf32>
    %11 = arith.mulf %9, %10 : vector<64x256xf32>
    %12 = vector.broadcast %6 : vector<64x1xf32> to vector<64x256xf32>
    %13 = arith.addf %12, %11 : vector<64x256xf32>
    %14 = vector.extract_strided_slice %5 {offsets = [0, 1], sizes = [64, 1], strides = [1, 1]} : vector<64x2xf32> to vector<64x1xf32>
    %15 = vector.extract_strided_slice %4 {offsets = [1, 0], sizes = [1, 256], strides = [1, 1]} : vector<2x256xf32> to vector<1x256xf32>
    %16 = vector.broadcast %14 : vector<64x1xf32> to vector<64x256xf32>
    %17 = vector.broadcast %15 : vector<1x256xf32> to vector<64x256xf32>
    %18 = arith.mulf %16, %17 : vector<64x256xf32>
    %19 = arith.addf %13, %18 : vector<64x256xf32>
    %cst = arith.constant 0.000000e+00 : f32
    %20 = vector.broadcast %cst : f32 to vector<64x256xf32>
    %21 = arith.cmpf oge, %19, %20 : vector<64x256xf32>
    %cst_7 = arith.constant 2.000000e-01 : f32
    %22 = vector.broadcast %cst_7 : f32 to vector<64x256xf32>
    %23 = arith.mulf %22, %19 : vector<64x256xf32>
    %24 = arith.select %21, %19, %23 : vector<64x256xi1>, vector<64x256xf32>
    %c256_i32 = arith.constant 256 : i32
    %25 = arith.muli %arg1, %c256_i32 : i32
    %26 = tpu.iota {dimensions = array<i32: 1>} : vector<1x256xi32>
    %27 = vector.broadcast %25 : i32 to vector<1x256xi32>
    %28 = arith.addi %27, %26 : vector<1x256xi32>
    %c400_i32 = arith.constant 400 : i32
    %29 = vector.broadcast %c400_i32 : i32 to vector<1x256xi32>
    %30 = arith.cmpi slt, %28, %29 : vector<1x256xi32>
    %cst_8 = arith.constant 0.000000e+00 : f32
    %31 = vector.shape_cast %30 : vector<1x256xi1> to vector<1x256xi1>
    %32 = vector.broadcast %31 : vector<1x256xi1> to vector<64x256xi1>
    %33 = vector.broadcast %cst_8 : f32 to vector<64x256xf32>
    %34 = arith.select %32, %24, %33 : vector<64x256xi1>, vector<64x256xf32>
    %c0_9 = arith.constant 0 : index
    %c0_10 = arith.constant 0 : index
    %c0_11 = arith.constant 0 : index
    %35 = vector.load %arg5[%c0_9, %c0_10, %c0_11] : memref<1x64x1xf32, #tpu.memory_space<vmem>>, vector<1x64x1xf32>
    %36 = vector.shape_cast %35 : vector<1x64x1xf32> to vector<64x1xf32>
    %cst_12 = arith.constant dense<0.000000e+00> : vector<64xf32>
    %37 = vector.multi_reduction <add>, %34, %cst_12 [1] : vector<64x256xf32> to vector<64xf32>
    %38 = vector.shape_cast %37 : vector<64xf32> to vector<64x1xf32>
    %39 = arith.addf %36, %38 : vector<64x1xf32>
    %c0_13 = arith.constant 0 : index
    %c0_14 = arith.constant 0 : index
    %c0_15 = arith.constant 0 : index
    %40 = vector.load %arg5[%c0_13, %c0_14, %c0_15] : memref<1x64x1xf32, #tpu.memory_space<vmem>>, vector<1x64x1xf32>
    %41 = vector.shape_cast %40 : vector<1x64x1xf32> to vector<64x1xf32>
    %42 = vector.shape_cast %39 : vector<64x1xf32> to vector<1x64x1xf32>
    tpu.vector_store %arg5[%c0_13, %c0_14, %c0_15], %42 {strides = array<i32>} : memref<1x64x1xf32, #tpu.memory_space<vmem>>, vector<1x64x1xf32>,
    %c0_16 = arith.constant 0 : index
    %c0_17 = arith.constant 0 : index
    %c0_18 = arith.constant 0 : index
    %43 = vector.load %arg6[%c0_16, %c0_17, %c0_18] : memref<1x64x64xf32, #tpu.memory_space<vmem>>, vector<1x64x64xf32>
    %44 = vector.shape_cast %43 : vector<1x64x64xf32> to vector<64x64xf32>
    %cst_19 = arith.constant dense<0.000000e+00> : vector<64x64xf32>
    %45 = tpu.matmul %34, %34, %cst_19 {dimension_numbers = #tpu.dot_dimension_numbers<[1], [1], [0], [0], [0, 0, 1, 0], [], []>} : vector<64x256xf32>, vector<64x256xf32>, vector<64x64xf32> -> vector<64x64xf32>
    %46 = arith.addf %44, %45 : vector<64x64xf32>
    %c0_20 = arith.constant 0 : index
    %c0_21 = arith.constant 0 : index
    %c0_22 = arith.constant 0 : index
    %47 = vector.load %arg6[%c0_20, %c0_21, %c0_22] : memref<1x64x64xf32, #tpu.memory_space<vmem>>, vector<1x64x64xf32>
    %48 = vector.shape_cast %47 : vector<1x64x64xf32> to vector<64x64xf32>
    %49 = vector.shape_cast %46 : vector<64x64xf32> to vector<1x64x64xf32>
    tpu.vector_store %arg6[%c0_20, %c0_21, %c0_22], %49 {strides = array<i32>} : memref<1x64x64xf32, #tpu.memory_space<vmem>>, vector<1x64x64xf32>,
    return
  }
  func.func @transform_0(%arg0: i32, %arg1: i32) -> (i32, i32, i32) {
    %c0_i32 = arith.constant 0 : i32
    %c0_i32_0 = arith.constant 0 : i32
    return %arg0, %c0_i32, %arg1 : i32, i32, i32
  }
  func.func @transform_1(%arg0: i32, %arg1: i32) -> (i32, i32) {
    %c0_i32 = arith.constant 0 : i32
    %c0_i32_0 = arith.constant 0 : i32
    %c0_i32_1 = arith.constant 0 : i32
    return %c0_i32, %c0_i32_0 : i32, i32
  }
  func.func @transform_2(%arg0: i32, %arg1: i32) -> (i32, i32) {
    %c0_i32 = arith.constant 0 : i32
    %c0_i32_0 = arith.constant 0 : i32
    %c0_i32_1 = arith.constant 0 : i32
    return %c0_i32, %c0_i32_0 : i32, i32
  }
  func.func @transform_3(%arg0: i32, %arg1: i32) -> (i32, i32, i32) {
    %c0_i32 = arith.constant 0 : i32
    %c0_i32_0 = arith.constant 0 : i32
    %c0_i32_1 = arith.constant 0 : i32
    return %arg0, %c0_i32, %c0_i32_0 : i32, i32, i32
  }
  func.func @transform_4(%arg0: i32, %arg1: i32) -> (i32, i32, i32) {
    %c0_i32 = arith.constant 0 : i32
    %c0_i32_0 = arith.constant 0 : i32
    %c0_i32_1 = arith.constant 0 : i32
    return %arg0, %c0_i32, %c0_i32_0 : i32, i32, i32
  }
}

</mosaic_0001>

<bundles_post_ra>
// kernel: tpu_custom_call.1
= control target key start
LH: loop header
LB: loop body
LE: loop exit
PB: predicated region body
PF: predicated region fallthrough
CT: control target
= control target key end

     0   :  { %10 = vsyncpa [#allocation3], 0  ;;  %s1639_s0 = inlined_call_operand.vmem [shape: f32[2,2,400], index: 0, kind: input, shape index: {}]   ;;  %s1640_s1 = inlined_call_operand.vmem [shape: f32[64,2], index: 1, kind: input, shape index: {}]   ;;  %s1641_s2 = inlined_call_operand.vmem [shape: f32[64,1], index: 2, kind: input, shape index: {}]   ;;  %s1642_s3 = inlined_call_operand.vmem [shape: f32[2,64,1], index: 3, kind: output, shape index: {0}]   ;;  %s1643_s4 = inlined_call_operand.hbm [shape: f32[2,64,64], index: 4, kind: output, shape index: {1}]  }
   0x1   :  { %12 = vsyncpa [#allocation3 + $0x1], 0  ;;  %s1170_s15 = smov 0   ;;  %s1172_s16 = smov 0  }
   0x2   :  { %s1174_s17 = smov 0   ;;  %s1176_s18 = smov 0  }
   0x3   :  { %s1178_s19 = smov 0   ;;  %s1180_s20 = smov 0  }
   0x4   :  { %s1182_s21 = smov 0   ;;  %s1184_s22 = smov 0  }
   0x5 LB: > { %s871_s23 = sadd.s32 4294967295, %s1137_s22   ;;  %s872_s24 = sadd.s32 4294967294, %s1137_s22   ;;  %s1137_s22 = sphi %s1184_s22, %s18_s22   ;;  %s1133_s21 = sphi %s1182_s21, %s1661_s21   ;;  %s1129_s20 = sphi %s1180_s20, %s1660_s20   ;;  %s1125_s19 = sphi %s1178_s19, %s1659_s19   ;;  %s1121_s18 = sphi %s1176_s18, %s1658_s18   ;;  %s1117_s17 = sphi %s1174_s17, %s1657_s17   ;;  %s1113_s16 = sphi %s1172_s16, %s1656_s16   ;;  %s1109_s15 = sphi %s1170_s15, %s1655_s15  }
   0x6   : > { %s27_s25 = sadd.s32 1, %s1129_s20  ;;  %s30_s26 = sadd.s32 1, %s1133_s21 }
   0x7   : > { %p28_p0 = scmp.ge.s32.totalorder %s27_s25, 2  ;;  %p143_p1 = scmp.ne.s32.totalorder %s1117_s17, %s1113_s16 }
   0x8   : > { %p144_p2 = scmp.eq.s32.totalorder %s871_s23, 3  ;;  %p149_p4 = scmp.ne.s32.totalorder %s1113_s16, %s1109_s15 }
   0x9   : > { %s1663_s25 = smov (%p28_p0, %s27_s25), 0  ;;  %s1665_s26 = smov (!%p28_p0, %s30_s26), %s1133_s21 }
   0xa   : > { %1645 = sst [smem:[#allocation5_spill]] %s1663_s25  ;;  %p1219_p3 = por %p144_p2, %p143_p1 }
   0xb   : > { %p32_p5 = scmp.ge.s32.totalorder %s1665_s26, 2  ;;  %p150_p6 = scmp.eq.s32.totalorder %s872_s24, 3 }
   0xc   : > { %p875_p7 = scmp.ge.s32.totalorder %s1137_s22, 1  ;;  %p187_p8 = scmp.lt.s32.totalorder %s1137_s22, 5 }
   0xd   : > { %s1667_s26 = smov (%p32_p5, %s1665_s26), 0  ;;  %p1229_p9 = por %p150_p6, %p149_p4 }
   0xe   : > { %1647 = sst [smem:[#allocation6_spill]] %s1667_s26  ;;  %p188_p10 = pnand %p875_p7, %p187_p8 }
   0xf   : > { %s130_s29 = ssub.s32 %s1133_s21, %s1667_s26  ;;  %s133_s30 = sadd.s32 1, %s1117_s17 }
  0x10   : > { %p131_p11 = scmp.eq.s32.totalorder %s130_s29, 0  ;;  %191 = sbr.rel (%p188_p10) target bundleno = 485 (0x1e5), region = 32 }
  0x11   : > { %s219_s6 = sand.u32 (!%p188_p10), 1, %s1113_s16   ;;  %s877_s7 = sshll.u32 (!%p188_p10), %s1121_s18, 1 }
  0x12   : > { %s1237_s5 = scalar_select %p131_p11, %s1117_s17, %s133_s30  }
  0x13   : > { %s876_s8 = sshll.u32 (!%p188_p10), %s219_s6, 6  ;;  %p223_p12 = scmp.lt.s32.totalorder (!%p188_p10), %s1125_s19, 1 }
  0x14   : > { %p225_p13 = scmp.lt.s32.totalorder (!%p188_p10), %s877_s7, 3  ;;  %s1255_s25 = scalar_lea.vmem (!%p188_p10), [#allocation2], %s876_s8 }
  0x15   : > { %p882_p0 = scmp.ne.s32.totalorder (!%p188_p10), %s1121_s18, 0 }
  0x17   : > { %s224_s9 = scalar_select %p223_p12, %s1125_s19, 1 }
  0x18   : > { %s1669_s7 = smov (!%p225_p13, %s877_s7), 3  ;;  %240 = sbr.rel (%p882_p0) target bundleno = 34 (0x22), region = 36 }
  0x19   : > { %s878_s10 = sshll.u32 %s224_s9, 2  ;;  %s921_s11 = sshll.u32 %s224_s9, 6  ;;  %vm241_vm0 = vcmask (!%p882_p0), 7168   ;;  %vm250_vm1 = vcmask (!%p882_p0), 523264   ;;  %v1139_v0 = vmov (!%p882_p0), 0.0  }
  0x1a   : > { %s228_s12 = sadd.s32 %s878_s10, %s1669_s7  ;;  %s1248_s23 = scalar_lea.vmem %s1642_s3, %s921_s11  ;;  %251 = vst.msk [vmem:[%s1255_s25] sm:$0xff] (!%p882_p0), %vm250_vm1, %v1139_v0  ;;  %252 = vst.msk [vmem:[%s1255_s25 + $0x8] sm:$0xff] (!%p882_p0), %vm250_vm1, %v1139_v0 }
  0x1b   : > { %s879_s24 = sshll.u32 %s228_s12, 1  ;;  %242 = vst.msk [vmem:[%s1248_s23] sm:$0xff] (!%p882_p0), %vm241_vm0, %v1139_v0  ;;  %243 = vst.msk [vmem:[%s1248_s23 + $0x8] sm:$0xff] (!%p882_p0), %vm241_vm0, %v1139_v0 }
  0x1c   : > { %s1253_s26 = scalar_lea.vmem %s1639_s0, %s879_s24  ;;  %244 = vst.msk [vmem:[%s1248_s23 + $0x10] sm:$0xff] (!%p882_p0), %vm241_vm0, %v1139_v0  ;;  %245 = vst.msk [vmem:[%s1248_s23 + $0x18] sm:$0xff] (!%p882_p0), %vm241_vm0, %v1139_v0 }
  0x1d   : > { %246 = vst.msk [vmem:[%s1248_s23 + $0x20] sm:$0xff] (!%p882_p0), %vm241_vm0, %v1139_v0  ;;  %247 = vst.msk [vmem:[%s1248_s23 + $0x28] sm:$0xff] (!%p882_p0), %vm241_vm0, %v1139_v0 }
  0x1e   : > { %248 = vst.msk [vmem:[%s1248_s23 + $0x30] sm:$0xff] (!%p882_p0), %vm241_vm0, %v1139_v0  ;;  %249 = vst.msk [vmem:[%s1248_s23 + $0x38] sm:$0xff] (!%p882_p0), %vm241_vm0, %v1139_v0 }
  0x1f   : > { %253 = vst.msk [vmem:[%s1255_s25 + $0x10] sm:$0xff] %vm250_vm1, %v1139_v0  ;;  %254 = vst.msk [vmem:[%s1255_s25 + $0x18] sm:$0xff] %vm250_vm1, %v1139_v0 }
  0x20   : > { %255 = vst.msk [vmem:[%s1255_s25 + $0x20] sm:$0xff] %vm250_vm1, %v1139_v0  ;;  %256 = vst.msk [vmem:[%s1255_s25 + $0x28] sm:$0xff] %vm250_vm1, %v1139_v0 }
  0x21   : > { %257 = vst.msk [vmem:[%s1255_s25 + $0x30] sm:$0xff] %vm250_vm1, %v1139_v0  ;;  %258 = vst.msk [vmem:[%s1255_s25 + $0x38] sm:$0xff] %vm250_vm1, %v1139_v0 }
  0x22 PF: > { %v268_v1 = vld [vmem:[%s1641_s2] sm:$0xff]  ;;  %v1140_v3 = vmov 0   ;;  %v269_v4 = vld [vmem:[%s1641_s2 + $0x8] sm:$0xff]  ;;  %v263_v6 = vld [vmem:[%s1640_s1 + $0x18] sm:$0xff]  ;;  %v1141_v7 = vmov 1   ;;  %v317_v19 = vlaneseq  ;;  %s883_s30 = sshll.u32 %s1121_s18, 8 }
  0x23   : > { %v260_v2 = vld [vmem:[%s1640_s1] sm:$0xff]  ;;  %1032 = vset.pattern.permute.xlu1 %v1140_v3  ;;  %1031 = vset.pattern.permute.xlu0 %v1140_v3  ;;  %v261_v5 = vld [vmem:[%s1640_s1 + $0x8] sm:$0xff]  ;;  %v262_v8 = vld [vmem:[%s1640_s1 + $0x10] sm:$0xff]  ;;  %v541_v38 = vstv %s883_s30  ;;  %s922_s18 = sshll.u32 %s1125_s19, 10  ;;  %s1587_s19 = scalar_lea.sflag [#allocation3], %s219_s6 }
  0x24   : > { %353 = vperm.xlu1 %1032, %v268_v1   ;;  %278 = vperm.xlu0 %1031, %v260_v2   ;;  %v270_v9 = vld [vmem:[%s1641_s2 + $0x10] sm:$0xff]  ;;  %v264_v10 = vld [vmem:[%s1640_s1 + $0x20] sm:$0xff]  ;;  %v271_v11 = vld [vmem:[%s1641_s2 + $0x18] sm:$0xff]  ;;  %v318_v20 = vshrl.u32 %v317_v19, 7  ;;  %v539_v30 = vand.u32 127, %v317_v19  ;;  %s1577_s8 = scalar_lea.hbm %s1643_s4, %s922_s18  ;;  %s1142_s10 = smov [#allocation2]  }
  0x25   : > { %v265_v12 = vld [vmem:[%s1640_s1 + $0x28] sm:$0xff]  ;;  %v267_v13 = vld [vmem:[%s1640_s1 + $0x38] sm:$0xff]  ;;  %v272_v14 = vld [vmem:[%s1641_s2 + $0x20] sm:$0xff]  ;;  %s1047_s11 = sshll.u32 %s1142_s10, 4  ;;  %s1048_s11 = int_to_ptr.vmem [resolvable:$false] %s1047_s11 }
  0x26   : > { %v266_v15 = vld [vmem:[%s1640_s1 + $0x30] sm:$0xff]  ;;  %v273_v16 = vld [vmem:[%s1641_s2 + $0x28] sm:$0xff]  ;;  %v275_v18 = vld [vmem:[%s1641_s2 + $0x38] sm:$0xff]  ;;  %v319_v21 = vsub.s32 0, %v318_v20  ;;  %v323_v22 = vsub.s32 2, %v318_v20  ;;  %v441_v24 = vsub.s32 1, %v318_v20  ;;  %v1342_v44 = vadd.s32 %v541_v38, %v539_v30 }
  0x27   : > { %v274_v17 = vld [vmem:[%s1641_s2 + $0x30] sm:$0xff]  ;;  %v259_v23 = vld [vmem:[%s1253_s26] sm:$0xf]  ;;  %v445_v25 = vsub.s32 3, %v318_v20  ;;  %v540_v37 = vadd.s32 128, %v539_v30  ;;  %s767_s26 = sshll.u32 %s1255_s25, 4  ;;  %s1579_s26 = int_to_ptr.vmem [resolvable:$true] %s767_s26 }
  0x28   : > { %358 = vperm.xlu1 %1032, %v269_v4   ;;  %283 = vperm.xlu0 %1031, %v261_v5   ;;  %v320_v28 = vrot.slane %v259_v23, %v319_v21  ;;  %v324_v29 = vrot.slane %v259_v23, %v323_v22  ;;  %v442_v31 = vrot.slane %v259_v23, %v441_v24  ;;  %vm544_vm2 = vcmp.lt.s32.totalorder %v1342_v44, 400  ;;  %v569_v44 = vld [vmem:[%s1248_s23 + $0x18] sm:$0xff]  ;;  %s1043_s9 = scalar_lea.vmem %s1579_s26, 1024  ;;  %s1049_s12 = scalar_lea.vmem %s1048_s11, 2048 }
  0x29   : > { %v446_v32 = vrot.slane %v259_v23, %v445_v25  ;;  %v1344_v45 = vadd.s32 %v541_v38, %v540_v37  ;;  %vm1390_vm9 = vmpackc.low %vm544_vm2, %vm544_vm2  ;;  %p1044_p1 = scmp.ne.s32.totalorder %s1579_s26, %s1043_s9  ;;  %p1050_p5 = scmp.lt.s32.totalorder %s1579_s26, %s1048_s11 }
  0x2a   : > { %v1332_v33 = vrot.slane %v320_v28, %v319_v21  ;;  %v1334_v34 = vrot.slane %v324_v29, %v319_v21  ;;  %v1338_v41 = vrot.slane %v442_v31, %v441_v24  ;;  %p1051_p6 = scmp.lt.s32.totalorder %s1049_s12, %s1043_s9 }
  0x2b   : > { %v1340_v42 = vrot.slane %v446_v32, %v441_v24  ;;  %vm545_vm3 = vcmp.lt.s32.totalorder %v1344_v45, 400  ;;  %v566_v45 = vld [vmem:[%s1248_s23] sm:$0xff]  ;;  %p1045_p2 = pnand %p1044_p1, %p1219_p3 }
  0x2c   : > { %1033 = vset.pattern.permute.xlu1 %v1141_v7  ;;  %293 = vperm.xlu0 %1031, %v263_v6   ;;  %vm1380_vm8 = vmpackc.low %vm545_vm3, %vm545_vm3  ;;  %p1052_p7 = por %p1051_p6, %p1050_p5 }
  0x2d   : > { %412 = vperm.xlu1 %1033, %v261_v5   ;;  %p1046_p4 = pneg %p1045_p2 }
  0x2f   : > { %p1053_p8 = pnand %p1052_p7, %p1046_p4 }
  0x30   : > { %1035 = vset.pattern.permute.xlu0 %v1141_v7 }
  0x31   : > { %1034 = vset.pattern.permute.xlu1 %v1140_v3  ;;  %408 = vperm.xlu0 %1035, %v260_v2  }
  0x32   : > { %288 = vperm.xlu1 %1034, %v262_v8  }
  0x35   : > { %416 = vperm.xlu0 %1035, %v262_v8  }
  0x36   : > { %363 = vperm.xlu1 %1034, %v270_v9  }
  0x39   : > { %424 = vperm.xlu0 %1035, %v264_v10  }
  0x3a   : > { %368 = vperm.xlu1 %1034, %v271_v11  }
  0x3d   : > { %1038 = vset.pattern.permute.xlu0 %v1140_v3 }
  0x3e   : > { %1036 = vset.pattern.permute.xlu1 %v1141_v7  ;;  %303 = vperm.xlu0 %1038, %v265_v12  }
  0x3f   : > { %420 = vperm.xlu1 %1036, %v263_v6  }
  0x42   : > { %313 = vperm.xlu0 %1038, %v267_v13  }
  0x43   : > { %1037 = vset.pattern.permute.xlu1 %v1140_v3 }
  0x44   : > { %298 = vperm.xlu1 %1037, %v264_v10  }
  0x46   : > { %1041 = vset.pattern.permute.xlu0 %v1141_v7 }
  0x47   : > { %432 = vperm.xlu0 %1041, %v266_v15  }
  0x48   : > { %373 = vperm.xlu1 %1037, %v272_v14  }
  0x4c   : > { %378 = vperm.xlu1 %1037, %v273_v16  }
  0x50   : > { %1039 = vset.pattern.permute.xlu1 %v1141_v7 }
  0x51   : > { %428 = vperm.xlu1 %1039, %v265_v12  }
  0x55   : > { %1040 = vset.pattern.permute.xlu1 %v1140_v3 }
  0x56   : > { %308 = vperm.xlu1 %1040, %v266_v15  }
  0x5a   : > { %383 = vperm.xlu1 %1040, %v274_v17  }
  0x5e   : > { %388 = vperm.xlu1 %1040, %v275_v18  }
  0x62   : > { %1042 = vset.pattern.permute.xlu1 %v1141_v7 }
  0x63   : > { %436 = vperm.xlu1 %1042, %v267_v13  }
  0xa3   : > { %v354_v26 = vpop.permute.xlu1 %353  ;;  %v279_v27 = vpop.permute.xlu0 %278 }
  0xa4   : > { %v335_v46 = vmul.f32 %v1332_v33, %v279_v27  ;;  %v336_v47 = vmul.f32 %v1334_v34, %v279_v27 }
  0xa6   : > { %v391_v55 = vadd.f32 %v354_v26, %v335_v46  ;;  %v392_v56 = vadd.f32 %v354_v26, %v336_v47 }
  0xa7   : > { %v359_v35 = vpop.permute.xlu1 %358  ;;  %v284_v36 = vpop.permute.xlu0 %283 }
  0xa8   : > { %v337_v39 = vmul.f32 %v1332_v33, %v284_v36  ;;  %v338_v40 = vmul.f32 %v1334_v34, %v284_v36 }
  0xaa   : > { %v393_v49 = vadd.f32 %v359_v35, %v337_v39  ;;  %v394_v50 = vadd.f32 %v359_v35, %v338_v40 }
  0xab   : > { %v294_v43 = vpop.permute.xlu0 %293 }
  0xac   : > { %v413_v48 = vpop.permute.xlu1 %412  ;;  %v341_v19 = vmul.f32 %v1332_v33, %v294_v43  ;;  %v342_v23 = vmul.f32 %v1334_v34, %v294_v43 }
  0xad   : > { %v459_v51 = vmul.f32 %v1338_v41, %v413_v48  ;;  %v460_v52 = vmul.f32 %v1340_v42, %v413_v48 }
  0xaf   : > { %v475_v53 = vadd.f32 %v459_v51, %v393_v49  ;;  %v476_v54 = vadd.f32 %v460_v52, %v394_v50 }
  0xb0   : > { %v409_v57 = vpop.permute.xlu0 %408 }
  0xb1   : > { %v507_v58 = vmul.f32 0.2, %v475_v53  ;;  %v508_v59 = vmul.f32 0.2, %v476_v54  ;;  %v457_v60 = vmul.f32 %v1338_v41, %v409_v57  ;;  %v458_v61 = vmul.f32 %v1340_v42, %v409_v57  ;;  %v289_v62 = vpop.permute.xlu1 %288 }
  0xb2   : > { %vm491_vm4 = vcmp.ge.f32.partialorder %v475_v53, 0.0  ;;  %vm492_vm5 = vcmp.ge.f32.partialorder %v476_v54, 0.0  ;;  %v339_v3 = vmul.f32 %v1332_v33, %v289_v62  ;;  %v340_v4 = vmul.f32 %v1334_v34, %v289_v62 }
  0xb3   : > { %v473_v63 = vadd.f32 %v457_v60, %v391_v55  ;;  %v474_v0 = vadd.f32 %v458_v61, %v392_v56  ;;  %v1354_v1 = vsel %vm491_vm4, %v475_v53, %v507_v58  ;;  %v1356_v2 = vsel %vm492_vm5, %v476_v54, %v508_v59 }
  0xb4   : > { %v417_v5 = vpop.permute.xlu0 %416  ;;  %v552_v6 = vsel %vm544_vm2, %v1354_v1, 0.0  ;;  %v553_v7 = vsel %vm545_vm3, %v1356_v2, 0.0 }
  0xb5   : > { %vm489_vm6 = vcmp.ge.f32.partialorder %v473_v63, 0.0  ;;  %v505_v8 = vmul.f32 0.2, %v473_v63  ;;  %v364_v9 = vpop.permute.xlu1 %363  ;;  %v461_v10 = vmul.f32 %v1338_v41, %v417_v5  ;;  %v462_v11 = vmul.f32 %v1340_v42, %v417_v5 }
  0xb6   : > { %v395_v12 = vadd.f32 %v364_v9, %v339_v3  ;;  %v396_v13 = vadd.f32 %v364_v9, %v340_v4  ;;  %v577_v14 = vadd.f32 %v553_v7, %v552_v6  ;;  %vm490_vm7 = vcmp.ge.f32.partialorder %v474_v0, 0.0 }
  0xb7   : > { %v506_v15 = vmul.f32 0.2, %v474_v0  ;;  %v1368_v16 = vsel %vm489_vm6, %v473_v63, %v505_v8 }
  0xb8   : > { %v477_v17 = vadd.f32 %v461_v10, %v395_v12  ;;  %v478_v18 = vadd.f32 %v462_v11, %v396_v13  ;;  %578 = vadd.xlane.f32.xlu0 %v577_v14  ;;  %v550_v22 = vsel %vm544_vm2, %v1368_v16, 0.0  ;;  %v926_v27 = vpack.c.bf16 %v1354_v1, %v1368_v16  ;;  %v425_v53 = vpop.permute.xlu0 %424 }
  0xb9   : > { %v522_v20 = vsel %vm490_vm7, %v474_v0, %v506_v15  ;;  %v369_v21 = vpop.permute.xlu1 %368  ;;  %v465_v54 = vmul.f32 %v1338_v41, %v425_v53  ;;  %v466_v55 = vmul.f32 %v1340_v42, %v425_v53 }
  0xba   : > { %v509_v24 = vmul.f32 0.2, %v477_v17  ;;  %v510_v25 = vmul.f32 0.2, %v478_v18  ;;  %900 = vmatprep.mubr.msk.f32.mxu0 %vm545_vm3, %v522_v20  ;;  %v923_v28 = vpack.c.bf16 %v1356_v2, %v522_v20  ;;  %v551_v30 = vsel %vm545_vm3, %v522_v20, 0.0 }
  0xbb   : > { %vm493_vm10 = vcmp.ge.f32.partialorder %v477_v17, 0.0  ;;  %vm494_vm11 = vcmp.ge.f32.partialorder %v478_v18, 0.0  ;;  %v574_v31 = vadd.f32 %v551_v30, %v550_v22  ;;  %v397_v40 = vadd.f32 %v369_v21, %v341_v19 }
  0xbc   : > { %v1396_v32 = vsel %vm493_vm10, %v477_v17, %v509_v24  ;;  %v1398_v35 = vsel %vm494_vm11, %v478_v18, %v510_v25  ;;  %925 = vmatprep.subr.msk.bf16.mxu0 %vm1380_vm8, %v923_v28  ;;  %947 = vmatprep.subr.msk.bf16.mxu1 %vm1380_vm8, %v923_v28  ;;  %v398_v43 = vadd.f32 %v369_v21, %v342_v23 }
  0xbd   : > { %v554_v36 = vsel %vm544_vm2, %v1396_v32, 0.0  ;;  %v555_v37 = vsel %vm545_vm3, %v1398_v35, 0.0  ;;  %928 = vmatpush1.bf16.xpose.msk.msra.mxu0 %vm1390_vm9, %v926_v27  ;;  %951 = vmatpush1.bf16.xpose.msk.msra.mxu1 %vm1390_vm9, %v926_v27  ;;  %v304_v6 = vpop.permute.xlu0 %303 }
  0xbe   : > { %v421_v38 = vpop.permute.xlu1 %420  ;;  %v580_v39 = vadd.f32 %v555_v37, %v554_v36  ;;  %575 = vadd.xlane.f32.xlu1 %v574_v31  ;;  %v345_v11 = vmul.f32 %v1332_v33, %v304_v6  ;;  %v346_v12 = vmul.f32 %v1334_v34, %v304_v6 }
  0xbf   : > { %v463_v46 = vmul.f32 %v1338_v41, %v421_v38  ;;  %v464_v47 = vmul.f32 %v1340_v42, %v421_v38 }
  0xc0   : > { %581 = vadd.xlane.f32.xlu0 %v580_v39 }
  0xc1   : > { %v479_v48 = vadd.f32 %v463_v46, %v397_v40  ;;  %v480_v49 = vadd.f32 %v464_v47, %v398_v43  ;;  %v314_v14 = vpop.permute.xlu0 %313 }
  0xc3   : > { %vm495_vm12 = vcmp.ge.f32.partialorder %v479_v48, 0.0  ;;  %vm496_vm13 = vcmp.ge.f32.partialorder %v480_v49, 0.0  ;;  %v511_v50 = vmul.f32 0.2, %v479_v48  ;;  %v512_v51 = vmul.f32 0.2, %v480_v49  ;;  %v299_v52 = vpop.permute.xlu1 %298 }
  0xc4   : > { %v343_v58 = vmul.f32 %v1332_v33, %v299_v52  ;;  %v344_v59 = vmul.f32 %v1334_v34, %v299_v52 }
  0xc5   : > { %v1418_v56 = vsel %vm495_vm12, %v479_v48, %v511_v50  ;;  %v1420_v57 = vsel %vm496_vm13, %v480_v49, %v512_v51 }
  0xc6   : > { %v929_v60 = vpack.c.bf16 %v1420_v57, %v1398_v35  ;;  %v932_v61 = vpack.c.bf16 %v1418_v56, %v1396_v32  ;;  %v556_v62 = vsel %vm544_vm2, %v1418_v56, 0.0  ;;  %v557_v63 = vsel %vm545_vm3, %v1420_v57, 0.0  ;;  %v433_v30 = vpop.permute.xlu0 %432 }
  0xc7   : > { %v374_v0 = vpop.permute.xlu1 %373  ;;  %v583_v3 = vadd.f32 %v557_v63, %v556_v62  ;;  %v469_v38 = vmul.f32 %v1338_v41, %v433_v30  ;;  %v470_v39 = vmul.f32 %v1340_v42, %v433_v30  ;;  %v572_v30 = vld [vmem:[%s1248_s23 + $0x30] sm:$0xff] }
  0xc8   : > { %v399_v4 = vadd.f32 %v374_v0, %v343_v58  ;;  %v400_v5 = vadd.f32 %v374_v0, %v344_v59  ;;  %931 = vmatprep.subr.msk.bf16.mxu0 %vm1380_vm8, %v929_v60  ;;  %948 = vmatprep.subr.msk.bf16.mxu1 %vm1380_vm8, %v929_v60 }
  0xc9   : > { %934 = vmatpush1.bf16.xpose.msk.msra.mxu0 %vm1390_vm9, %v932_v61  ;;  %952 = vmatpush1.bf16.xpose.msk.msra.mxu1 %vm1390_vm9, %v932_v61 }
  0xca   : > { %v481_v7 = vadd.f32 %v465_v54, %v399_v4  ;;  %v482_v8 = vadd.f32 %v466_v55, %v400_v5  ;;  %584 = vadd.xlane.f32.xlu1 %v583_v3  ;;  %v349_v3 = vmul.f32 %v1332_v33, %v314_v14  ;;  %v350_v4 = vmul.f32 %v1334_v34, %v314_v14 }
  0xcb   : > { %v379_v9 = vpop.permute.xlu1 %378 }
  0xcc   : > { %v513_v10 = vmul.f32 0.2, %v481_v7  ;;  %vm498_vm14 = vcmp.ge.f32.partialorder %v482_v8, 0.0  ;;  %v514_v13 = vmul.f32 0.2, %v482_v8  ;;  %vm497_vm15 = vcmp.ge.f32.partialorder %v481_v7, 0.0 }
  0xcd   : > { %v401_v19 = vadd.f32 %v379_v9, %v345_v11  ;;  %v402_v22 = vadd.f32 %v379_v9, %v346_v12 }
  0xce   : > { %v1444_v15 = vsel %vm497_vm15, %v481_v7, %v513_v10  ;;  %v530_v17 = vsel %vm498_vm14, %v482_v8, %v514_v13 }
  0xcf   : > { %v558_v18 = vsel %vm544_vm2, %v1444_v15, 0.0  ;;  %908 = vmatprep.mubr.msk.f32.mxu1 %vm545_vm3, %v530_v17  ;;  %v559_v21 = vsel %vm545_vm3, %v530_v17, 0.0 }
  0xd0   : > { %v429_v20 = vpop.permute.xlu1 %428  ;;  %v586_v25 = vadd.f32 %v559_v21, %v558_v18 }
  0xd1   : > { %v467_v23 = vmul.f32 %v1338_v41, %v429_v20  ;;  %v468_v24 = vmul.f32 %v1340_v42, %v429_v20 }
  0xd2   : > { %587 = vadd.xlane.f32.xlu0 %v586_v25  ;;  %v571_v25 = vld [vmem:[%s1248_s23 + $0x28] sm:$0xff] }
  0xd3   : > { %v483_v27 = vadd.f32 %v467_v23, %v401_v19  ;;  %v484_v28 = vadd.f32 %v468_v24, %v402_v22 }
  0xd5   : > { %vm499_vm0 = vcmp.ge.f32.partialorder %v483_v27, 0.0  ;;  %vm500_vm1 = vcmp.ge.f32.partialorder %v484_v28, 0.0  ;;  %v515_v31 = vmul.f32 0.2, %v483_v27  ;;  %v516_v36 = vmul.f32 0.2, %v484_v28  ;;  %v309_v37 = vpop.permute.xlu1 %308 }
  0xd6   : > { %v347_v46 = vmul.f32 %v1332_v33, %v309_v37  ;;  %v348_v47 = vmul.f32 %v1334_v34, %v309_v37  ;;  %v573_v37 = vld [vmem:[%s1248_s23 + $0x38] sm:$0xff] }
  0xd7   : > { %v531_v40 = vsel %vm499_vm0, %v483_v27, %v515_v31  ;;  %v532_v43 = vsel %vm500_vm1, %v484_v28, %v516_v36 }
  0xd8   : > { %v938_v48 = vpack.c.bf16 %v531_v40, %v1444_v15  ;;  %v935_v49 = vpack.c.bf16 %v532_v43, %v530_v17  ;;  %v560_v50 = vsel %vm544_vm2, %v531_v40, 0.0  ;;  %v561_v51 = vsel %vm545_vm3, %v532_v43, 0.0 }
  0xd9   : > { %v384_v52 = vpop.permute.xlu1 %383  ;;  %v589_v53 = vadd.f32 %v561_v51, %v560_v50 }
  0xda   : > { %v403_v54 = vadd.f32 %v384_v52, %v347_v46  ;;  %v404_v55 = vadd.f32 %v384_v52, %v348_v47  ;;  %937 = vmatprep.subr.msk.bf16.mxu0 %vm1380_vm8, %v935_v49  ;;  %949 = vmatprep.subr.msk.bf16.mxu1 %vm1380_vm8, %v935_v49  ;;  %v616_v52 = vld [vmem:[%s1255_s25 + $0x8] sm:$0xff] }
  0xdb   : > { %940 = vmatpush1.bf16.xpose.msk.msra.mxu0 %vm1390_vm9, %v938_v48  ;;  %953 = vmatpush1.bf16.xpose.msk.msra.mxu1 %vm1390_vm9, %v938_v48 }
  0xdc   : > { %v485_v58 = vadd.f32 %v469_v38, %v403_v54  ;;  %v486_v59 = vadd.f32 %v470_v39, %v404_v55  ;;  %590 = vadd.xlane.f32.xlu1 %v589_v53  ;;  %v620_v53 = vld [vmem:[%s1255_s25 + $0x28] sm:$0xff] }
  0xdd   : > { %v389_v60 = vpop.permute.xlu1 %388 }
  0xde   : > { %v517_v61 = vmul.f32 0.2, %v485_v58  ;;  %v518_v62 = vmul.f32 0.2, %v486_v59  ;;  %vm501_vm4 = vcmp.ge.f32.partialorder %v485_v58, 0.0  ;;  %vm502_vm5 = vcmp.ge.f32.partialorder %v486_v59, 0.0 }
  0xdf   : > { %v405_v9 = vadd.f32 %v389_v60, %v349_v3  ;;  %v406_v10 = vadd.f32 %v389_v60, %v350_v4 }
  0xe0   : > { %v533_v63 = vsel %vm501_vm4, %v485_v58, %v517_v61  ;;  %v534_v0 = vsel %vm502_vm5, %v486_v59, %v518_v62  ;;  %v617_v62 = vld [vmem:[%s1255_s25 + $0x10] sm:$0xff] }
  0xe1   : > { %v562_v5 = vsel %vm544_vm2, %v533_v63, 0.0  ;;  %v563_v6 = vsel %vm545_vm3, %v534_v0, 0.0 }
  0xe2   : > { %v437_v7 = vpop.permute.xlu1 %436  ;;  %v592_v8 = vadd.f32 %v563_v6, %v562_v5 }
  0xe3   : > { %v471_v11 = vmul.f32 %v1338_v41, %v437_v7  ;;  %v472_v12 = vmul.f32 %v1340_v42, %v437_v7  ;;  %v567_v42 = vld [vmem:[%s1248_s23 + $0x8] sm:$0xff] }
  0xe4   : > { %593 = vadd.xlane.f32.xlu0 %v592_v8  ;;  %v618_v8 = vld [vmem:[%s1255_s25 + $0x18] sm:$0xff] }
  0xe5   : > { %v487_v13 = vadd.f32 %v471_v11, %v405_v9  ;;  %v488_v17 = vadd.f32 %v472_v12, %v406_v10  ;;  %v622_v9 = vld [vmem:[%s1255_s25 + $0x38] sm:$0xff] }
  0xe7   : > { %vm503_vm6 = vcmp.ge.f32.partialorder %v487_v13, 0.0  ;;  %vm504_vm7 = vcmp.ge.f32.partialorder %v488_v17, 0.0  ;;  %v519_v33 = vmul.f32 0.2, %v487_v13  ;;  %v520_v34 = vmul.f32 0.2, %v488_v17 }
  0xe9   : > { %v535_v14 = vsel %vm503_vm6, %v487_v13, %v519_v33  ;;  %v536_v18 = vsel %vm504_vm7, %v488_v17, %v520_v34 }
  0xea   : > { %v941_v19 = vpack.c.bf16 %v536_v18, %v534_v0  ;;  %v944_v20 = vpack.c.bf16 %v535_v14, %v533_v63  ;;  %v564_v21 = vsel %vm544_vm2, %v535_v14, 0.0  ;;  %v565_v22 = vsel %vm545_vm3, %v536_v18, 0.0 }
  0xeb   : > { %v595_v41 = vadd.f32 %v565_v22, %v564_v21 }
  0xec   : > { %943 = vmatprep.subr.msk.bf16.mxu0 %vm1380_vm8, %v941_v19  ;;  %950 = vmatprep.subr.msk.bf16.mxu1 %vm1380_vm8, %v941_v19  ;;  %vm606_vm8 = vcmask 7168  }
  0xed   : > { %946 = vmatpush1.bf16.xpose.msk.msra.mxu0 %vm1390_vm9, %v944_v20  ;;  %954 = vmatpush1.bf16.xpose.msk.msra.mxu1 %vm1390_vm9, %v944_v20 }
  0xee   : > { %596 = vadd.xlane.f32.xlu1 %v595_v41 }
  0xf4   : > { %901 = vmatmul.mubr.msk.f32.vlgmr.msra.gmra.mrb[0].mxu0 %vm544_vm2, %v1368_v16  ;;  %909 = vmatmul.mubr.msk.f32.vlgmr.msra.gmra.mrb[0].mxu1 %vm544_vm2, %v1444_v15  ;;  %v568_v16 = vld [vmem:[%s1248_s23 + $0x10] sm:$0xff]  ;;  %v570_v15 = vld [vmem:[%s1248_s23 + $0x20] sm:$0xff] }
  0xf5   : > { %902 = vmatprep.mubr.msk.f32.mxu0 %vm545_vm3, %v1356_v2  ;;  %910 = vmatprep.mubr.msk.f32.mxu1 %vm545_vm3, %v532_v43  ;;  %v619_v43 = vld [vmem:[%s1255_s25 + $0x20] sm:$0xff] }
  0xf8   : > { %903 = vmatmul.mubr.msk.f32.gmra.mrb[2].mxu0 %vm544_vm2, %v1354_v1  ;;  %911 = vmatmul.mubr.msk.f32.gmra.mrb[2].mxu1 %vm544_vm2, %v531_v40  ;;  %v615_v40 = vld [vmem:[%s1255_s25] sm:$0xff] }
  0xf9   : > { %904 = vmatprep.mubr.msk.f32.mxu0 %vm545_vm3, %v1398_v35  ;;  %912 = vmatprep.mubr.msk.f32.mxu1 %vm545_vm3, %v534_v0 }
  0xfc   : > { %905 = vmatmul.mubr.msk.f32.gmra.mrb[4].mxu0 %vm544_vm2, %v1396_v32  ;;  %913 = vmatmul.mubr.msk.f32.gmra.mrb[4].mxu1 %vm544_vm2, %v533_v63  ;;  %v621_v63 = vld [vmem:[%s1255_s25 + $0x30] sm:$0xff] }
  0xfd   : > { %906 = vmatprep.mubr.msk.f32.mxu0 %vm545_vm3, %v1420_v57  ;;  %914 = vmatprep.mubr.msk.f32.mxu1 %vm545_vm3, %v536_v18 }
 0x100   : > { %907 = vmatmul.mubr.msk.f32.gmra.mrb[6].mxu0 %vm544_vm2, %v1418_v56  ;;  %915 = vmatmul.mubr.msk.f32.gmra.mrb[6].mxu1 %vm544_vm2, %v535_v14  ;;  %vm736_vm2 = vcmask 523264  }
 0x145   : > { %v579_v1 = vpop.xlane.xlu0 %578 }
 0x146   : > { %v599_v2 = vadd.f32 %v579_v1, %v567_v42 }
 0x148   : > { %608 = vst.msk [vmem:[%s1248_s23 + $0x8] sm:$0xff] %vm606_vm8, %v599_v2 }
 0x14b   : > { %v576_v26 = vpop.xlane.xlu1 %575 }
 0x14c   : > { %v598_v29 = vadd.f32 %v576_v26, %v566_v45 }
 0x14d   : > { %v582_v32 = vpop.xlane.xlu0 %581 }
 0x14e   : > { %v600_v35 = vadd.f32 %v582_v32, %v568_v16  ;;  %607 = vst.msk [vmem:[%s1248_s23] sm:$0xff] %vm606_vm8, %v598_v29 }
 0x150   : > { %609 = vst.msk [vmem:[%s1248_s23 + $0x10] sm:$0xff] %vm606_vm8, %v600_v35 }
 0x157   : > { %v585_v56 = vpop.xlane.xlu1 %584 }
 0x158   : > { %v601_v57 = vadd.f32 %v585_v56, %v569_v44 }
 0x15a   : > { %610 = vst.msk [vmem:[%s1248_s23 + $0x18] sm:$0xff] %vm606_vm8, %v601_v57 }
 0x15f   : > { %v588_v23 = vpop.xlane.xlu0 %587 }
 0x160   : > { %v602_v24 = vadd.f32 %v588_v23, %v570_v15 }
 0x162   : > { %611 = vst.msk [vmem:[%s1248_s23 + $0x20] sm:$0xff] %vm606_vm8, %v602_v24 }
 0x169   : > { %v591_v27 = vpop.xlane.xlu1 %590 }
 0x16a   : > { %v603_v28 = vadd.f32 %v591_v27, %v571_v25 }
 0x16c   : > { %612 = vst.msk [vmem:[%s1248_s23 + $0x28] sm:$0xff] %vm606_vm8, %v603_v28 }
 0x171   : > { %v594_v31 = vpop.xlane.xlu0 %593 }
 0x172   : > { %v604_v36 = vadd.f32 %v594_v31, %v572_v30 }
 0x174   : > { %613 = vst.msk [vmem:[%s1248_s23 + $0x30] sm:$0xff] %vm606_vm8, %v604_v36 }
 0x17b   : > { %v597_v38 = vpop.xlane.xlu1 %596 }
 0x17c   : > { %v605_v39 = vadd.f32 %v597_v38, %v573_v37 }
 0x17e   : > { %614 = vst.msk [vmem:[%s1248_s23 + $0x38] sm:$0xff] %vm606_vm8, %v605_v39 }
 0x1c7   : > { %v689_v46 = vpop.f32.mrb[0].mxu0  ;;  %v709_v47 = vpop.f32.mrb[0].mxu1 }
 0x1c8   : > { %v728_v48 = vadd.f32 %v689_v46, %v615_v40  ;;  %v732_v49 = vadd.f32 %v709_v47, %v619_v43  ;;  %v691_v50 = vpop.f32.mrb[1].mxu0  ;;  %v711_v51 = vpop.f32.mrb[1].mxu1 }
 0x1ca   : > { %737 = vst.msk [vmem:[%s1255_s25] sm:$0xff] %vm736_vm2, %v728_v48  ;;  %741 = vst.msk [vmem:[%s1255_s25 + $0x20] sm:$0xff] %vm736_vm2, %v732_v49 }
 0x1cb   : > { %v694_v54 = vpop.f32.mrb[2].mxu0  ;;  %v714_v55 = vpop.f32.mrb[2].mxu1 }
 0x1cc   : > { %v729_v58 = vadd.f32 %v694_v54, %v616_v52  ;;  %v733_v59 = vadd.f32 %v714_v55, %v620_v53  ;;  %v696_v60 = vpop.f32.mrb[3].mxu0  ;;  %v716_v61 = vpop.f32.mrb[3].mxu1 }
 0x1ce   : > { %738 = vst.msk [vmem:[%s1255_s25 + $0x8] sm:$0xff] %vm736_vm2, %v729_v58  ;;  %742 = vst.msk [vmem:[%s1255_s25 + $0x28] sm:$0xff] %vm736_vm2, %v733_v59 }
 0x1cf   : > { %v699_v0 = vpop.f32.mrb[4].mxu0  ;;  %v719_v3 = vpop.f32.mrb[4].mxu1 }
 0x1d0   : > { %v730_v4 = vadd.f32 %v699_v0, %v617_v62  ;;  %v734_v5 = vadd.f32 %v719_v3, %v621_v63  ;;  %v701_v6 = vpop.f32.mrb[5].mxu0  ;;  %v721_v7 = vpop.f32.mrb[5].mxu1 }
 0x1d2   : > { %739 = vst.msk [vmem:[%s1255_s25 + $0x10] sm:$0xff] %vm736_vm2, %v730_v4  ;;  %743 = vst.msk [vmem:[%s1255_s25 + $0x30] sm:$0xff] %vm736_vm2, %v734_v5 }
 0x1d3   : > { %v704_v10 = vpop.f32.mrb[6].mxu0  ;;  %v724_v11 = vpop.f32.mrb[6].mxu1 }
 0x1d4   : > { %v731_v12 = vadd.f32 %v704_v10, %v618_v8  ;;  %v735_v13 = vadd.f32 %v724_v11, %v622_v9  ;;  %v706_v17 = vpop.f32.mrb[7].mxu0  ;;  %v726_v33 = vpop.f32.mrb[7].mxu1 }
 0x1d6   : > { %740 = vst.msk [vmem:[%s1255_s25 + $0x18] sm:$0xff] %vm736_vm2, %v731_v12  ;;  %744 = vst.msk [vmem:[%s1255_s25 + $0x38] sm:$0xff] %vm736_vm2, %v735_v13 }
 0x1d7   : > { %1056 = shalt.err (!%p1053_p8)
}
 0x1d8   : > { %s1057_s25 = scalar_lea.hbm %s1577_s8, 1024  ;;  %s1061_s14 = scalar_lea.hbm %s1643_s4, 2048 }
 0x1d9   : > { %p1058_p10 = scmp.ne.s32.totalorder %s1577_s8, %s1057_s25  ;;  %p1062_p13 = scmp.lt.u32.totalorder %s1577_s8, %s1643_s4 }
 0x1da   : > { %p1063_p0 = scmp.lt.u32.totalorder %s1061_s14, %s1057_s25  ;;  %p1065_p2 = scmp.lt.u32.totalorder %s1057_s25, %s1577_s8 }
 0x1db   : > { %p1059_p11 = pnand %p1058_p10, %p1219_p3 }
 0x1dc   : > { %p1064_p1 = por %p1063_p0, %p1062_p13 }
 0x1dd   : > { %p1060_p12 = pneg %p1059_p11 }
 0x1de   : > { %p1066_p4 = por %p1065_p2, %p1064_p1 }
 0x1e0   : > { %p1067_p5 = pnand %p1066_p4, %p1060_p12 }
 0x1e2   : > { %1070 = shalt.err (!%p1067_p5)
}
 0x1e3   : > { %s1143_s30 = smov 128   ;;  %s1144_s18 = smov 8  }
 0x1e4   : > { %955 = dma.vmem_to_hbm [thread:$0]  (%p1219_p3), %s1579_s26, 1024, %s1577_s8, %s1587_s19, %s1143_s30, %s1143_s30, %s1144_s18  }
 0x1e5 PF: > { %p961_p6 = scmp.ge.s32.totalorder %s1137_s22, 2  ;;  %s790_s23 = sand.u32 1, %s1109_s15  }
 0x1e6   : > { %s791_s7 = scalar_lea.sflag [#allocation3], %s790_s23 }
 0x1e7   : > { %p958_p7 = pnand %p961_p6, %p1229_p9 }
 0x1e9   : > { %1104 = dma.done.wait (!%p958_p7), %s791_s7, 1024  }
 0x1ea   : > { %1106 = vsyncadd (!%p958_p7), %s791_s7, 4294966272  ;;  %s18_s22 = sadd.s32 1, %s1137_s22   ;;  %s1653_s27 = sld [smem:[#allocation5_spill]] }
 0x1eb   : > { %p15_p8 = scmp.ge.s32.totalorder %s18_s22, 6   ;;  %s1654_s26 = sld [smem:[#allocation6_spill]] }
 0x1ec   : > { %s1655_s15 = smov %s1113_s16  ;;  %s1656_s16 = smov %s1117_s17 }
 0x1ed   : > { %s1657_s17 = smov %s1237_s5  ;;  %s1658_s18 = smov %s1129_s20 }
 0x1ee   : > { %s1659_s19 = smov %s1133_s21  ;;  %17 = sbr.rel (!%p15_p8) target bundleno = 5 (0x5), region = 83 }
 0x1f0   : > { %s1660_s20 = smov %s1653_s27 }
 0x1f1   : > { %s1661_s21 = smov %s1654_s26 }
 0x1f5   :  { %796 = vsyncpa [#allocation3], 1 }
 0x1f6   :  { %798 = vsyncpa [#allocation3 + $0x1], 1 }

</bundles_post_ra>
